<compile_context>
chip_gen: v7x
topology: tpu7x:2x2x1
jax: 0.10.0
libtpu: 0.0.40
codegen_flags: <defaults>
</compile_context>

<pallas_src>
import functools

import jax
import jax.numpy as jnp
from jax.experimental import pallas as pl
from jax.experimental.pallas import tpu as pltpu


# ---------------------------------------------------------------------------
# helpers
# ---------------------------------------------------------------------------
def _round_up(n, m):
    return ((n + m - 1) // m) * m


def _pad2d(a, rows, cols):
    r, c = a.shape
    if r == rows and c == cols:
        return a
    return jnp.pad(a, ((0, rows - r), (0, cols - c)))


def _single_buffered_spec(shape, index_map):
    """Constant-index blocks gain nothing from double buffering; keep one copy."""
    try:
        return pl.BlockSpec(shape, index_map, pipeline_mode=pl.Buffered(1))
    except TypeError:            # older jax without pipeline_mode on BlockSpec
        return pl.BlockSpec(shape, index_map)


def _vmem_budget_bytes():
    cap = 128 * 1024 * 1024      # v5e/v6e physical VMEM
    try:
        info = pltpu.get_tpu_info()
        cap = int(getattr(info, "vmem_capacity_bytes", cap))
    except Exception:
        pass
    # ~7/8 of physical: ~56 MiB on v7x (64 MiB), ~112 MiB on v5e/v6e (128 MiB)
    return (cap * 7) // 8


def _fused_ws(tm, d_in_p, h_p, d_out_p, cbytes, obytes):
    """VMEM working set of the fused path (weights single-buffered)."""
    return ((d_in_p * h_p + h_p * d_out_p) * cbytes   # resident W1/W2 (x1)
            + (h_p + d_out_p) * 4                      # biases (f32)
            + 2 * tm * d_in_p * 4                      # double-buffered f32 x
            + 2 * tm * d_out_p * obytes                # double-buffered out
            + tm * (d_in_p + h_p) * cbytes             # in-kernel cast temps
            + tm * h_p * 4)                            # f32 hidden


def _htiled_ws(tm, th, d_in_p, h_p, d_out_p, cbytes, obytes):
    """VMEM working set of the H-tiled fallback path."""
    return (2 * (d_in_p * th + th * d_out_p) * cbytes  # streamed W1/W2 tiles (x2)
            + 2 * th * 4 + d_out_p * 4                 # b1 tiles (x2) + b2 (x1)
            + 2 * tm * d_in_p * 4                      # double-buffered f32 x
            + 2 * tm * d_out_p * obytes                # double-buffered out
            + tm * d_out_p * 4                         # f32 accumulator scratch
            + tm * (d_in_p + th) * cbytes + tm * th * 4)


# ---------------------------------------------------------------------------
# kernels
# ---------------------------------------------------------------------------
def _fused_kernel(x_ref, w1_ref, b1_ref, w2_ref, b2_ref, o_ref, *, compute_dtype):
    # hidden = relu(x @ W1 + b1); x cast in-kernel rides VPU slack under the MXU
    x = x_ref[...].astype(compute_dtype)
    h = jnp.dot(x, w1_ref[...], preferred_element_type=jnp.float32)
    h = jnp.maximum(h + b1_ref[...], 0.0)
    out = jnp.dot(h.astype(compute_dtype), w2_ref[...],
                  preferred_element_type=jnp.float32)
    o_ref[...] = (out + b2_ref[...]).astype(o_ref.dtype)


def _htiled_kernel(x_ref, w1_ref, b1_ref, w2_ref, b2_ref, o_ref, acc_ref, *,
                   compute_dtype):
    k = pl.program_id(1)

    @pl.when(k == 0)
    def _():
        acc_ref[...] = jnp.zeros_like(acc_ref)

    x = x_ref[...].astype(compute_dtype)
    h = jnp.dot(x, w1_ref[...], preferred_element_type=jnp.float32)
    h = jnp.maximum(h + b1_ref[...], 0.0)          # b1 slice matches this H tile
    acc_ref[...] += jnp.dot(h.astype(compute_dtype), w2_ref[...],
                            preferred_element_type=jnp.float32)

    @pl.when(k == pl.num_programs(1) - 1)
    def _():
        o_ref[...] = (acc_ref[...] + b2_ref[...]).astype(o_ref.dtype)


# ---------------------------------------------------------------------------
# wrapper
# ---------------------------------------------------------------------------
def prepare_params(w1, b1, w2, b2, compute_dtype=jnp.bfloat16):
    """Zero-pad feature dims to the 128-lane width and cast weights ONCE.

    w1: (D_in, H), b1: (1, H) or (H,), w2: (H, D_out), b2: (1, D_out) or (D_out,)
    Returns ((w1_p, b1_p, w2_p, b2_p), (D_in, H, D_out)).
    """
    d_in, h = w1.shape
    d_out = w2.shape[1]
    d_in_p, h_p, d_out_p = (_round_up(d, 128) for d in (d_in, h, d_out))
    w1_p = _pad2d(jnp.asarray(w1), d_in_p, h_p).astype(compute_dtype)
    b1_p = _pad2d(jnp.asarray(b1).reshape(1, -1), 1, h_p).astype(jnp.float32)
    w2_p = _pad2d(jnp.asarray(w2), h_p, d_out_p).astype(compute_dtype)
    b2_p = _pad2d(jnp.asarray(b2).reshape(1, -1), 1, d_out_p).astype(jnp.float32)
    return (w1_p, b1_p, w2_p, b2_p), (d_in, h, d_out)


@functools.partial(jax.jit,
                   static_argnames=("dims", "out_dtype", "compute_dtype"))
def two_layer_net(x, params, *, dims, out_dtype=jnp.float32,
                  compute_dtype=jnp.bfloat16):
    """Fused MLP forward: relu(x @ w1 + b1) @ w2 + b2 (params from prepare_params)."""
    w1_p, b1_p, w2_p, b2_p = params
    d_in, h, d_out = dims
    B = x.shape[0]
    D_in_p, H_p = w1_p.shape
    D_out_p = w2_p.shape[1]

    cbytes = jnp.dtype(compute_dtype).itemsize
    obytes = jnp.dtype(out_dtype).itemsize
    budget = _vmem_budget_bytes()
    slop = lambda n: (n * 5) // 4            # 25% margin over the hand count

    B_p16 = _round_up(max(B, 1), 16)
    tm_floor = min(128, B_p16)
    fused_fits = slop(_fused_ws(tm_floor, D_in_p, H_p, D_out_p,
                                cbytes, obytes)) <= budget

    if fused_fits:
        # ----------------- fused, fully-resident-weights path ---------------
        if B_p16 <= 128:
            tm = B_p16                        # tiny batch: one 16-aligned tile
        else:
            cands = [t for t in (512, 256, 128)
                     if slop(_fused_ws(t, D_in_p, H_p, D_out_p,
                                       cbytes, obytes)) <= budget]
            if not cands:
                cands = [128]
            # least batch padding first, then the biggest tile
            tm = min(cands, key=lambda t: (_round_up(B, t), -t))
        B_p = _round_up(B, tm)
        # Split a single-step grid so both v7x TensorCores get work.
        if B_p == tm and B_p >= 256:
            tm = _round_up(-(-B_p // 2), 128)
            B_p = _round_up(B, tm)
        grid = (B_p // tm,)

        x_p = _pad2d(x, B_p, D_in_p)          # stays f32; cast happens in-kernel

        cost = pl.CostEstimate(
            flops=2 * B_p * (D_in_p * H_p + H_p * D_out_p),
            transcendentals=0,
            bytes_accessed=(x_p.size * x_p.dtype.itemsize
                            + (w1_p.size + w2_p.size) * cbytes
                            + (b1_p.size + b2_p.size) * 4
                            + B_p * D_out_p * obytes))

        out_p = pl.pallas_call(
            functools.partial(_fused_kernel, compute_dtype=compute_dtype),
            out_shape=jax.ShapeDtypeStruct((B_p, D_out_p), out_dtype),
            grid=grid,
            in_specs=[
                pl.BlockSpec((tm, D_in_p), lambda i: (i, 0)),            # x streams
                _single_buffered_spec((D_in_p, H_p), lambda i: (0, 0)),  # W1 resident
                _single_buffered_spec((1, H_p), lambda i: (0, 0)),       # b1 resident
                _single_buffered_spec((H_p, D_out_p), lambda i: (0, 0)),  # W2 resident
                _single_buffered_spec((1, D_out_p), lambda i: (0, 0)),   # b2 resident
            ],
            out_specs=pl.BlockSpec((tm, D_out_p), lambda i: (i, 0)),
            compiler_params=pltpu.CompilerParams(
                dimension_semantics=("parallel",),
                vmem_limit_bytes=int(budget)),
            cost_estimate=cost,
        )(x_p, w1_p, b1_p, w2_p, b2_p)
    else:
        # ------------- H-tiled fallback (weights stream through VMEM) -------
        # TODO(synk): also tile D_in / D_out for weights that exceed VMEM even at th=128.
        tm = 128 if B_p16 > 128 else B_p16
        th = 128
        for t in (2048, 1024, 512, 256, 128):
            if H_p % t == 0 and slop(_htiled_ws(tm, t, D_in_p, H_p, D_out_p,
                                                cbytes, obytes)) <= budget:
                th = t
                break
        if B_p16 > 128:
            for t in (512, 256):
                if (_round_up(B, t) <= _round_up(B, 128)
                        and slop(_htiled_ws(t, th, D_in_p, H_p, D_out_p,
                                            cbytes, obytes)) <= budget):
                    tm = t
                    break
        B_p = _round_up(B, tm)
        grid = (B_p // tm, H_p // th)         # reduction axis (H) last

        x_p = _pad2d(x, B_p, D_in_p)

        cost = pl.CostEstimate(
            flops=2 * B_p * (D_in_p * H_p + H_p * D_out_p),
            transcendentals=0,
            bytes_accessed=((B_p // tm) * (w1_p.size + w2_p.size) * cbytes
                            + x_p.size * x_p.dtype.itemsize
                            + (b1_p.size + b2_p.size) * 4
                            + B_p * D_out_p * obytes))

        out_p = pl.pallas_call(
            functools.partial(_htiled_kernel, compute_dtype=compute_dtype),
            out_shape=jax.ShapeDtypeStruct((B_p, D_out_p), out_dtype),
            grid=grid,
            in_specs=[
                pl.BlockSpec((tm, D_in_p), lambda i, k: (i, 0)),
                pl.BlockSpec((D_in_p, th), lambda i, k: (0, k)),
                pl.BlockSpec((1, th), lambda i, k: (0, k)),
                pl.BlockSpec((th, D_out_p), lambda i, k: (k, 0)),
                _single_buffered_spec((1, D_out_p), lambda i, k: (0, 0)),
            ],
            out_specs=pl.BlockSpec((tm, D_out_p), lambda i, k: (i, 0)),
            scratch_shapes=[pltpu.VMEM((tm, D_out_p), jnp.float32)],
            compiler_params=pltpu.CompilerParams(
                dimension_semantics=("parallel", "arbitrary"),
                vmem_limit_bytes=int(budget)),
            cost_estimate=cost,
        )(x_p, w1_p, b1_p, w2_p, b2_p)

    return out_p[:B, :d_out]


# ---------------------------------------------------------------------------
# references
# ---------------------------------------------------------------------------
def reference_f32(x, w1, b1, w2, b2):
    h = jnp.maximum(x @ w1 + b1, 0.0)
    return h @ w2 + b2


def reference_bf16(x, w1, b1, w2, b2):
    # Same bf16-operand / f32-accumulate math as the kernel.
    xb, w1b, w2b = (a.astype(jnp.bfloat16) for a in (x, w1, w2))
    h = jnp.maximum(
        jnp.dot(xb, w1b, preferred_element_type=jnp.float32) + b1, 0.0)
    return jnp.dot(h.astype(jnp.bfloat16), w2b,
                   preferred_element_type=jnp.float32) + b2


if __name__ == "__main__":
    # Shapes implied by TwoLayerNet(input_size, hidden_size, output_size)
    batch, input_size, hidden_size, output_size = 8, 16, 32, 4

    key = jax.random.PRNGKey(0)
    kx, k1, k2, k3, k4 = jax.random.split(key, 5)

    x = jax.random.normal(kx, (batch, input_size), dtype=jnp.float32)

    # PyTorch-style uniform(-1/sqrt(fan_in), 1/sqrt(fan_in)) init, W stored as (in, out).
    bound1 = 1.0 / (input_size ** 0.5)
    w1 = jax.random.uniform(k1, (input_size, hidden_size), jnp.float32, -bound1, bound1)
    b1 = jax.random.uniform(k2, (1, hidden_size), jnp.float32, -bound1, bound1)
    bound2 = 1.0 / (hidden_size ** 0.5)
    w2 = jax.random.uniform(k3, (hidden_size, output_size), jnp.float32, -bound2, bound2)
    b2 = jax.random.uniform(k4, (1, output_size), jnp.float32, -bound2, bound2)

    params, dims = prepare_params(w1, b1, w2, b2)          # pad + cast once
    out = two_layer_net(x, params, dims=dims)
    out = jax.block_until_ready(out)

    assert out.shape == (batch, output_size)
    # Tight check against the matching bf16-operand reference.
    ref_b = reference_bf16(x, w1, b1, w2, b2)
    assert jnp.allclose(out, ref_b, atol=1e-3, rtol=1e-3), "mismatch vs bf16 reference"
    # Loose check against the pure-f32 PyTorch-equivalent forward.
    ref_f = reference_f32(x, w1, b1, w2, b2)
    assert jnp.allclose(out, ref_f, atol=5e-2, rtol=5e-2), "mismatch vs f32 reference"

    print("KERNEL_OK")
</pallas_src>

<mosaic_0001>
module attributes {stable_mosaic.version = 11 : i64} {
  func.func @_fused_kernel(%arg0: i32, %arg1: memref<16x128xf32, #tpu.memory_space<vmem>>, %arg2: memref<128x128xbf16, #tpu.memory_space<vmem>>, %arg3: memref<1x128xf32, #tpu.memory_space<vmem>>, %arg4: memref<128x128xbf16, #tpu.memory_space<vmem>>, %arg5: memref<1x128xf32, #tpu.memory_space<vmem>>, %arg6: memref<16x128xf32, #tpu.memory_space<vmem>>) attributes {dimension_semantics = [#tpu.dimension_semantics<parallel>], iteration_bounds = array<i64: 1>, scalar_prefetch = 0 : i64, scratch_operands = 0 : i64, tpu.core_type = #tpu.core_type<tc>, window_params = [{transform_indices = @transform_0, window_bounds = array<i64: 16, 128>}, {pipeline_mode = #tpu.pipeline_mode<synchronous>, transform_indices = @transform_1, window_bounds = array<i64: 128, 128>}, {pipeline_mode = #tpu.pipeline_mode<synchronous>, transform_indices = @transform_2, window_bounds = array<i64: 1, 128>}, {pipeline_mode = #tpu.pipeline_mode<synchronous>, transform_indices = @transform_3, window_bounds = array<i64: 128, 128>}, {pipeline_mode = #tpu.pipeline_mode<synchronous>, transform_indices = @transform_4, window_bounds = array<i64: 1, 128>}, {transform_indices = @transform_5, window_bounds = array<i64: 16, 128>}]} {
    %c0 = arith.constant 0 : index
    %c0_0 = arith.constant 0 : index
    %0 = vector.load %arg1[%c0, %c0_0] : memref<16x128xf32, #tpu.memory_space<vmem>>, vector<16x128xf32>
    %1 = arith.truncf %0 : vector<16x128xf32> to vector<16x128xbf16>
    %c0_1 = arith.constant 0 : index
    %c0_2 = arith.constant 0 : index
    %2 = vector.load %arg2[%c0_1, %c0_2] : memref<128x128xbf16, #tpu.memory_space<vmem>>, vector<128x128xbf16>
    %cst = arith.constant dense<0.000000e+00> : vector<16x128xf32>
    %3 = tpu.matmul %1, %2, %cst {dimension_numbers = #tpu.dot_dimension_numbers<[1], [0], [0], [1], [0, 0, 1, 1], [], []>} : vector<16x128xbf16>, vector<128x128xbf16>, vector<16x128xf32> -> vector<16x128xf32>
    %c0_3 = arith.constant 0 : index
    %c0_4 = arith.constant 0 : index
    %4 = vector.load %arg3[%c0_3, %c0_4] : memref<1x128xf32, #tpu.memory_space<vmem>>, vector<1x128xf32>
    %5 = vector.broadcast %4 : vector<1x128xf32> to vector<16x128xf32>
    %6 = arith.addf %3, %5 : vector<16x128xf32>
    %cst_5 = arith.constant 0.000000e+00 : f32
    %7 = vector.broadcast %cst_5 : f32 to vector<16x128xf32>
    %8 = arith.maximumf %6, %7 : vector<16x128xf32>
    %9 = arith.truncf %8 : vector<16x128xf32> to vector<16x128xbf16>
    %c0_6 = arith.constant 0 : index
    %c0_7 = arith.constant 0 : index
    %10 = vector.load %arg4[%c0_6, %c0_7] : memref<128x128xbf16, #tpu.memory_space<vmem>>, vector<128x128xbf16>
    %cst_8 = arith.constant dense<0.000000e+00> : vector<16x128xf32>
    %11 = tpu.matmul %9, %10, %cst_8 {dimension_numbers = #tpu.dot_dimension_numbers<[1], [0], [0], [1], [0, 0, 1, 1], [], []>} : vector<16x128xbf16>, vector<128x128xbf16>, vector<16x128xf32> -> vector<16x128xf32>
    %c0_9 = arith.constant 0 : index
    %c0_10 = arith.constant 0 : index
    %12 = vector.load %arg5[%c0_9, %c0_10] : memref<1x128xf32, #tpu.memory_space<vmem>>, vector<1x128xf32>
    %13 = vector.broadcast %12 : vector<1x128xf32> to vector<16x128xf32>
    %14 = arith.addf %11, %13 : vector<16x128xf32>
    %c0_11 = arith.constant 0 : index
    %c0_12 = arith.constant 0 : index
    %15 = vector.load %arg6[%c0_11, %c0_12] : memref<16x128xf32, #tpu.memory_space<vmem>>, vector<16x128xf32>
    tpu.vector_store %arg6[%c0_11, %c0_12], %14 {strides = array<i32>} : memref<16x128xf32, #tpu.memory_space<vmem>>, vector<16x128xf32>,
    return
  }
  func.func @transform_0(%arg0: i32) -> (i32, i32) {
    %c0_i32 = arith.constant 0 : i32
    %c0_i32_0 = arith.constant 0 : i32
    return %arg0, %c0_i32 : i32, i32
  }
  func.func @transform_1(%arg0: i32) -> (i32, i32) {
    %c0_i32 = arith.constant 0 : i32
    %c0_i32_0 = arith.constant 0 : i32
    %c0_i32_1 = arith.constant 0 : i32
    return %c0_i32, %c0_i32_0 : i32, i32
  }
  func.func @transform_2(%arg0: i32) -> (i32, i32) {
    %c0_i32 = arith.constant 0 : i32
    %c0_i32_0 = arith.constant 0 : i32
    %c0_i32_1 = arith.constant 0 : i32
    return %c0_i32, %c0_i32_0 : i32, i32
  }
  func.func @transform_3(%arg0: i32) -> (i32, i32) {
    %c0_i32 = arith.constant 0 : i32
    %c0_i32_0 = arith.constant 0 : i32
    %c0_i32_1 = arith.constant 0 : i32
    return %c0_i32, %c0_i32_0 : i32, i32
  }
  func.func @transform_4(%arg0: i32) -> (i32, i32) {
    %c0_i32 = arith.constant 0 : i32
    %c0_i32_0 = arith.constant 0 : i32
    %c0_i32_1 = arith.constant 0 : i32
    return %c0_i32, %c0_i32_0 : i32, i32
  }
  func.func @transform_5(%arg0: i32) -> (i32, i32) {
    %c0_i32 = arith.constant 0 : i32
    %c0_i32_0 = arith.constant 0 : i32
    return %arg0, %c0_i32 : i32, i32
  }
}

</mosaic_0001>

<bundles_post_ra>
// kernel: two_layer_net.1
= control target key start
LH: loop header
LB: loop body
LE: loop exit
PB: predicated region body
PF: predicated region fallthrough
CT: control target
= control target key end

     0   :  { %10 = vsyncpa [#allocation3], 0  ;;  %s701_s0 = inlined_call_operand.hbm [shape: f32[16,128], index: 0, kind: input, shape index: {}]   ;;  %s702_s1 = inlined_call_operand.hbm [shape: bf16[128,128], index: 1, kind: input, shape index: {}]   ;;  %s703_s2 = inlined_call_operand.hbm [shape: f32[1,128], index: 2, kind: input, shape index: {}]   ;;  %s704_s3 = inlined_call_operand.hbm [shape: bf16[128,128], index: 3, kind: input, shape index: {}]   ;;  %s705_s4 = inlined_call_operand.hbm [shape: f32[1,128], index: 4, kind: input, shape index: {}]   ;;  %s706_s5 = inlined_call_operand.hbm [shape: f32[16,128], index: 5, kind: output, shape index: {}]  }
   0x1   :  { %11 = vsyncpa [#allocation6], 0 }
   0x2   :  { %12 = vsyncpa [#allocation9], 0 }
   0x3   :  { %13 = vsyncpa [#allocation4], 0  ;;  %s581_s18 = smov [#allocation5]   ;;  %s441_s22 = scalar_lea.hbm %s702_s1, 1024 }
   0x4   :  { %s31_s19 = sshll.u32 %s581_s18, 4  ;;  %p442_p0 = scmp.ne.s32.totalorder %s702_s1, %s441_s22  ;;  %s32_s19 = int_to_ptr.vmem [resolvable:$true] %s31_s19 }
   0x5   :  { %p445_p1 = scmp.lt.u32.totalorder %s441_s22, %s702_s1 }
   0x7   :  { %p447_p2 = pnand %p445_p1, %p442_p0 }
   0x9   :  { %450 = shalt.err (!%p447_p2)
}
   0xa   :  { %s451_s27 = scalar_lea.vmem %s32_s19, 1024  ;;  %p456_p4 = scmp.lt.s32.totalorder %s32_s19, %s32_s19 }
   0xb   :  { %p452_p3 = scmp.ne.s32.totalorder %s32_s19, %s451_s27  ;;  %p457_p5 = scmp.lt.s32.totalorder %s451_s27, %s451_s27 }
   0xd   :  { %p458_p6 = por %p457_p5, %p456_p4 }
   0xf   :  { %p459_p7 = pnand %p458_p6, %p452_p3 }
  0x11   :  { %462 = shalt.err (!%p459_p7)
}
  0x12   :  { %s582_s28 = smov 64   ;;  %s583_s29 = smov 4  }
  0x13   :  { %37 = dma.hbm_to_vmem [thread:$0]  %s702_s1, 1024, %s32_s19, [#allocation6], %s582_s28, %s582_s28, %s583_s29  }
  0x14   :  { %s584_s7 = smov [#allocation8]   ;;  %s585_s9 = smov [#allocation2]  }
  0x15   :  { %s53_s8 = sshll.u32 %s584_s7, 4  ;;  %s19_s10 = sshll.u32 %s585_s9, 4  ;;  %s54_s8 = int_to_ptr.vmem [resolvable:$true] %s53_s8  ;;  %s20_s10 = int_to_ptr.vmem [resolvable:$true] %s19_s10 }
  0x16   :  { %s463_s13 = scalar_lea.hbm %s704_s3, 1024 }
  0x17   :  { %p464_p8 = scmp.ne.s32.totalorder %s704_s3, %s463_s13  ;;  %p467_p9 = scmp.lt.u32.totalorder %s463_s13, %s704_s3 }
  0x19   :  { %p469_p10 = pnand %p467_p9, %p464_p8 }
  0x1b   :  { %472 = shalt.err (!%p469_p10)
}
  0x1c   :  { %s473_s1 = scalar_lea.vmem %s54_s8, 1024  ;;  %p478_p12 = scmp.lt.s32.totalorder %s54_s8, %s54_s8 }
  0x1d   :  { %p474_p11 = scmp.ne.s32.totalorder %s54_s8, %s473_s1  ;;  %p479_p13 = scmp.lt.s32.totalorder %s473_s1, %s473_s1 }
  0x1f   :  { %p480_p0 = por %p479_p13, %p478_p12 }
  0x21   :  { %p481_p1 = pnand %p480_p0, %p474_p11 }
  0x23   :  { %484 = shalt.err (!%p481_p1)
}
  0x24   :  { %59 = dma.hbm_to_vmem [thread:$0]  %s704_s3, 1024, %s54_s8, [#allocation9], %s582_s28, %s582_s28, %s583_s29  }
  0x25   :  { %s485_s22 = scalar_lea.hbm %s701_s0, 256 }
  0x26   :  { %p486_p2 = scmp.ne.s32.totalorder %s701_s0, %s485_s22  ;;  %p489_p3 = scmp.lt.u32.totalorder %s485_s22, %s701_s0 }
  0x28   :  { %p491_p4 = pnand %p489_p3, %p486_p2 }
  0x2a   :  { %494 = shalt.err (!%p491_p4)
}
  0x2b   :  { %s495_s27 = scalar_lea.vmem %s20_s10, 256  ;;  %p500_p6 = scmp.lt.s32.totalorder %s20_s10, %s20_s10 }
  0x2c   :  { %p496_p5 = scmp.ne.s32.totalorder %s20_s10, %s495_s27  ;;  %p501_p7 = scmp.lt.s32.totalorder %s495_s27, %s495_s27 }
  0x2e   :  { %p502_p8 = por %p501_p7, %p500_p6 }
  0x30   :  { %p503_p9 = pnand %p502_p8, %p496_p5 }
  0x32   :  { %506 = shalt.err (!%p503_p9)
}
  0x33   :  { %s586_s3 = smov 128   ;;  %s587_s28 = smov 8  }
  0x34   :  { %25 = dma.hbm_to_vmem [thread:$0]  %s701_s0, 256, %s20_s10, [#allocation3], %s586_s3, %s586_s3, %s587_s28  }
  0x35   :  { %s588_s6 = smov [#allocation7]   ;;  %s589_s8 = smov [#allocation10]  }
  0x36   :  { %s44_s7 = sshll.u32 %s588_s6, 4  ;;  %s66_s9 = sshll.u32 %s589_s8, 4  ;;  %s45_s7 = int_to_ptr.vmem [resolvable:$true] %s44_s7  ;;  %s67_s9 = int_to_ptr.vmem [resolvable:$true] %s66_s9 }
  0x37   :  { %s507_s13 = scalar_lea.hbm %s703_s2, 16 }
  0x38   :  { %p508_p10 = scmp.ne.s32.totalorder %s703_s2, %s507_s13  ;;  %p511_p11 = scmp.lt.u32.totalorder %s507_s13, %s703_s2 }
  0x3a   :  { %p513_p12 = pnand %p511_p11, %p508_p10 }
  0x3c   :  { %516 = shalt.err (!%p513_p12)
}
  0x3d   :  { %s517_s0 = scalar_lea.vmem %s45_s7, 16  ;;  %s521_s10 = scalar_lea.vmem %s45_s7, 32 }
  0x3e   :  { %p518_p13 = scmp.ne.s32.totalorder %s45_s7, %s517_s0  ;;  %p522_p0 = scmp.lt.s32.totalorder %s45_s7, %s45_s7 }
  0x3f   :  { %p523_p1 = scmp.lt.s32.totalorder %s521_s10, %s517_s0 }
  0x41   :  { %p524_p2 = por %p523_p1, %p522_p0 }
  0x43   :  { %p525_p3 = pnand %p524_p2, %p518_p13 }
  0x45   :  { %528 = shalt.err (!%p525_p3)
}
  0x46   :  { %47 = dma.hbm_to_vmem [thread:$0]  %s703_s2, 16, %s45_s7, [#allocation6]  }
  0x47   :  { %s529_s21 = scalar_lea.hbm %s705_s4, 16 }
  0x48   :  { %p530_p4 = scmp.ne.s32.totalorder %s705_s4, %s529_s21  ;;  %p533_p5 = scmp.lt.u32.totalorder %s529_s21, %s705_s4 }
  0x4a   :  { %p535_p6 = pnand %p533_p5, %p530_p4 }
  0x4c   :  { %538 = shalt.err (!%p535_p6)
}
  0x4d   :  { %s539_s26 = scalar_lea.vmem %s67_s9, 16  ;;  %s543_s27 = scalar_lea.vmem %s67_s9, 32 }
  0x4e   :  { %p540_p7 = scmp.ne.s32.totalorder %s67_s9, %s539_s26  ;;  %p544_p8 = scmp.lt.s32.totalorder %s67_s9, %s67_s9 }
  0x4f   :  { %p545_p9 = scmp.lt.s32.totalorder %s543_s27, %s539_s26 }
  0x51   :  { %p546_p10 = por %p545_p9, %p544_p8 }
  0x53   :  { %p547_p11 = pnand %p546_p10, %p540_p7 }
  0x55   :  { %550 = shalt.err (!%p547_p11)
}
  0x56   :  { %69 = dma.hbm_to_vmem [thread:$0]  %s705_s4, 16, %s67_s9, [#allocation9]  }
  0x57   :  { %573 = dma.done.wait [#allocation3], 256  }
  0x58   :  { %574 = vsyncadd [#allocation3], 4294967040 }
  0x59   :  { %575 = dma.done.wait [#allocation6], 1040  }
  0x5a   :  { %576 = vsyncadd [#allocation6], 4294966256 }
  0x5b   :  { %577 = dma.done.wait [#allocation9], 1040  }
  0x5c   :  { %578 = vsyncadd [#allocation9], 4294966256  ;;  %v590_v0 = vmov 0.0   ;;  %vm591_vm0 = vmmov 0   ;;  %v425_v1 = vld [vmem:[#allocation5] sm:$0xff]   ;;  %v426_v2 = vld [vmem:[#allocation5 + $0x8] sm:$0xff]  }
  0x5d   :  { %373 = vmatprep.subr.bf16.mxu0 %v590_v0  ;;  %389 = vmatprep.mubr.msk.bf16.mxu0 %vm591_vm0, %v590_v0  ;;  %v427_v3 = vld [vmem:[#allocation5 + $0x10] sm:$0xff]   ;;  %v433_v4 = vld [vmem:[#allocation8] sm:$0xff]   ;;  %v428_v5 = vld [vmem:[#allocation5 + $0x18] sm:$0xff]   ;;  %s592_s4 = smov [#allocation11]  }
  0x5e   :  { %393 = vmatprep.subr.bf16.mxu1 %v590_v0  ;;  %409 = vmatprep.mubr.msk.bf16.mxu1 %vm591_vm0, %v590_v0  ;;  %v434_v6 = vld [vmem:[#allocation8 + $0x8] sm:$0xff]   ;;  %v429_v7 = vld [vmem:[#allocation5 + $0x20] sm:$0xff]   ;;  %v435_v8 = vld [vmem:[#allocation8 + $0x10] sm:$0xff]   ;;  %s323_s30 = sshll.u32 %s592_s4, 4  ;;  %s324_s30 = int_to_ptr.vmem [resolvable:$true] %s323_s30 }
  0x5f   :  { %374 = vmatpush3.bf16.msra.mxu0 %v425_v1  ;;  %394 = vmatpush3.bf16.msra.mxu1 %v433_v4  ;;  %v430_v9 = vld [vmem:[#allocation5 + $0x28] sm:$0xff]   ;;  %v436_v10 = vld [vmem:[#allocation8 + $0x18] sm:$0xff]   ;;  %v431_v11 = vld [vmem:[#allocation5 + $0x30] sm:$0xff]   ;;  %s551_s6 = scalar_lea.vmem %s324_s30, 256  ;;  %p556_p13 = scmp.lt.s32.totalorder %s324_s30, %s324_s30 }
  0x60   :  { %375 = vmatprep.subr.bf16.mxu0 %v590_v0  ;;  %395 = vmatprep.subr.bf16.mxu1 %v590_v0  ;;  %v437_v12 = vld [vmem:[#allocation8 + $0x20] sm:$0xff]   ;;  %v432_v13 = vld [vmem:[#allocation5 + $0x38] sm:$0xff]   ;;  %v86_v14 = vld [vmem:[#allocation2] sm:$0xff]  ;;  %p552_p12 = scmp.ne.s32.totalorder %s324_s30, %s551_s6  ;;  %p557_p0 = scmp.lt.s32.totalorder %s551_s6, %s551_s6 }
  0x61   :  { %v87_v15 = vld [vmem:[#allocation2 + $0x8] sm:$0xff]  ;;  %v438_v16 = vld [vmem:[#allocation8 + $0x28] sm:$0xff]   ;;  %v337_v20 = vld [vmem:[#allocation7] ss:$0 sm:$0xff] }
  0x62   :  { %v88_v17 = vpack.c.bf16 %v87_v15, %v86_v14  ;;  %v439_v18 = vld [vmem:[#allocation8 + $0x30] sm:$0xff]   ;;  %v440_v19 = vld [vmem:[#allocation8 + $0x38] sm:$0xff]   ;;  %v346_v30 = vld [vmem:[#allocation10] ss:$0 sm:$0xff]  ;;  %p558_p1 = por %p557_p0, %p556_p13 }
  0x63   :  { %376 = vmatpush3.bf16.msra.mxu0 %v426_v2  ;;  %396 = vmatpush3.bf16.msra.mxu1 %v434_v6 }
  0x64   :  { %377 = vmatprep.subr.bf16.mxu0 %v590_v0  ;;  %397 = vmatprep.subr.bf16.mxu1 %v590_v0  ;;  %p559_p2 = pnand %p558_p1, %p552_p12 }
  0x67   :  { %378 = vmatpush3.bf16.msra.mxu0 %v427_v3  ;;  %398 = vmatpush3.bf16.msra.mxu1 %v435_v8 }
  0x68   :  { %379 = vmatprep.subr.bf16.mxu0 %v590_v0  ;;  %399 = vmatprep.subr.bf16.mxu1 %v590_v0 }
  0x6b   :  { %380 = vmatpush3.bf16.msra.mxu0 %v428_v5  ;;  %400 = vmatpush3.bf16.msra.mxu1 %v436_v10 }
  0x6c   :  { %381 = vmatprep.subr.bf16.mxu0 %v590_v0  ;;  %401 = vmatprep.subr.bf16.mxu1 %v590_v0 }
  0x6f   :  { %382 = vmatpush3.bf16.msra.mxu0 %v429_v7  ;;  %402 = vmatpush3.bf16.msra.mxu1 %v437_v12 }
  0x70   :  { %383 = vmatprep.subr.bf16.mxu0 %v590_v0  ;;  %403 = vmatprep.subr.bf16.mxu1 %v590_v0 }
  0x73   :  { %384 = vmatpush3.bf16.msra.mxu0 %v430_v9  ;;  %404 = vmatpush3.bf16.msra.mxu1 %v438_v16 }
  0x74   :  { %385 = vmatprep.subr.bf16.mxu0 %v590_v0  ;;  %405 = vmatprep.subr.bf16.mxu1 %v590_v0 }
  0x77   :  { %386 = vmatpush3.bf16.msra.mxu0 %v431_v11  ;;  %406 = vmatpush3.bf16.msra.mxu1 %v439_v18 }
  0x78   :  { %387 = vmatprep.subr.bf16.mxu0 %v590_v0  ;;  %407 = vmatprep.subr.bf16.mxu1 %v590_v0 }
  0x7b   :  { %388 = vmatpush3.bf16.msra.mxu0 %v432_v13  ;;  %408 = vmatpush3.bf16.msra.mxu1 %v440_v19 }
  0x7e   :  { %390 = vmatmul.mubr.bf16.vlgmr.msra.gmra.mrb[0].mxu0 %v88_v17 }
 0x151   :  { %v194_v21 = vpop.f32.mrb[0].mxu0 }
 0x152   :  { %v195_v22 = vadd.f32 %v337_v20, %v194_v21  ;;  %v391_v23 = vpop.f32.mrb[1].mxu0 }
 0x153   :  { %v197_v24 = vpop.f32.mrb[2].mxu0 }
 0x154   :  { %v198_v25 = vadd.f32 %v337_v20, %v197_v24  ;;  %v392_v26 = vpop.f32.mrb[3].mxu0  ;;  %v201_v27 = vmax.f32 %v195_v22, 0.0 }
 0x156   :  { %v202_v28 = vmax.f32 %v198_v25, 0.0 }
 0x158   :  { %v203_v29 = vpack.c.bf16 %v202_v28, %v201_v27 }
 0x15a   :  { %410 = vmatmul.mubr.bf16.vlgmr.msra.gmra.mrb[0].mxu1 %v203_v29 }
 0x22d   :  { %v309_v31 = vpop.f32.mrb[0].mxu1 }
 0x22e   :  { %v310_v32 = vadd.f32 %v346_v30, %v309_v31  ;;  %v411_v33 = vpop.f32.mrb[1].mxu1 }
 0x22f   :  { %v312_v34 = vpop.f32.mrb[2].mxu1 }
 0x230   :  { %316 = vst [vmem:[#allocation11] sm:$0xff] %v310_v32  ;;  %v313_v35 = vadd.f32 %v346_v30, %v312_v34  ;;  %v412_v36 = vpop.f32.mrb[3].mxu1 }
 0x232   :  { %317 = vst [vmem:[#allocation11 + $0x8] sm:$0xff] %v313_v35 }
 0x233   :  { %562 = shalt.err (!%p559_p2)
}
 0x234   :  { %s563_s9 = scalar_lea.hbm %s706_s5, 256 }
 0x235   :  { %p564_p3 = scmp.ne.s32.totalorder %s706_s5, %s563_s9  ;;  %p567_p4 = scmp.lt.u32.totalorder %s563_s9, %s706_s5 }
 0x237   :  { %p569_p5 = pnand %p567_p4, %p564_p3 }
 0x239   :  { %572 = shalt.err (!%p569_p5)
}
 0x23a   :  { %329 = dma.vmem_to_hbm [thread:$0]  %s324_s30, 256, %s706_s5, [#allocation4], %s586_s3, %s586_s3, %s587_s28  }
 0x23b   :  { %579 = dma.done.wait [#allocation4], 256  }
 0x23c   :  { %580 = vsyncadd [#allocation4], 4294967040 }
 0x23d   :  { %333 = vsyncpa [#allocation3], 1 }
 0x23e   :  { %334 = vsyncpa [#allocation6], 1 }
 0x23f   :  { %335 = vsyncpa [#allocation9], 1 }
 0x240   :  { %336 = vsyncpa [#allocation4], 1 }

</bundles_post_ra>
